<compile_context>
chip_gen: v6e
topology: v6e:2x2x1
jax: 0.10.0
libtpu: 0.0.40
codegen_flags: <defaults>
</compile_context>

<pallas_src>
import jax
import jax.numpy as jnp
import numpy as np
from jax.experimental import pallas as pl
from jax.experimental.pallas import tpu as pltpu

LN_EPS = 1e-5     # torch.nn.LayerNorm default
N_HEADS = 2


# ------------------------------- kernel ------------------------------------
def _ln_relu(x, gamma, beta):
    # One-pass LayerNorm (var = E[x^2] - mu^2), f32 throughout, fused ReLU.
    mu = jnp.mean(x, axis=-1, keepdims=True)
    ms = jnp.mean(x * x, axis=-1, keepdims=True)
    var = ms - mu * mu
    y = (x - mu) * jax.lax.rsqrt(var + LN_EPS) * gamma + beta
    return jnp.maximum(y, 0.0)


def critic_kernel(xu_ref, w1_ref, v1_ref, w2_ref, v2_ref, w3_ref, b3_ref,
                  out_ref):
    # xu_ref: (B, D_in)
    # w1_ref: (2, D_in, H)   v1_ref: (2, 3, H) rows = [b1, gamma1, beta1]
    # w2_ref: (2, H, H)      v2_ref: (2, 3, H) rows = [b2, gamma2, beta2]
    # w3_ref: (2, 1, H)      b3_ref: (1, 2)
    # out_ref: (B, 2)  -- column h holds Q_h
    xu = xu_ref[...]
    b3 = b3_ref[...]

    for h in range(N_HEADS):                       # statically unrolled twin heads
        v1 = v1_ref[h]                             # (3, H)
        v2 = v2_ref[h]                             # (3, H)

        # Linear 1 + LayerNorm + ReLU
        x = jnp.dot(xu, w1_ref[h], preferred_element_type=jnp.float32) + v1[0:1]
        x = _ln_relu(x, v1[1:2], v1[2:3])

        # Linear 2 + LayerNorm + ReLU
        x = jnp.dot(x, w2_ref[h], preferred_element_type=jnp.float32) + v2[0:1]
        x = _ln_relu(x, v2[1:2], v2[2:3])

        # Final Linear(H, 1): VPU multiply + lane reduction (no N=1 MXU matmul).
        q = jnp.sum(x * w3_ref[h], axis=-1, keepdims=True) + b3[0:1, h:h + 1]
        out_ref[:, h:h + 1] = q


# ------------------------------- wrapper ------------------------------------
def critic_forward(state, action, params):
    """Returns (q1, q2), each of shape (B, 1)."""
    xu = jnp.concatenate([state, action], axis=1).astype(jnp.float32)
    B = xu.shape[0]

    def vmem():
        return pl.BlockSpec(memory_space=pltpu.MemorySpace.VMEM)

    out = pl.pallas_call(
        critic_kernel,
        out_shape=jax.ShapeDtypeStruct((B, N_HEADS), jnp.float32),
        in_specs=[vmem() for _ in range(7)],
        out_specs=vmem(),
    )(xu,
      params["w1"], params["v1"],
      params["w2"], params["v2"],
      params["w3"], params["b3"])
    return out[:, 0:1], out[:, 1:2]


# ----------------------------- parameter init -------------------------------
def _xavier_uniform(key, fan_in, fan_out):
    bound = np.sqrt(6.0 / (fan_in + fan_out))
    return jax.random.uniform(key, (fan_in, fan_out), jnp.float32, -bound, bound)


def init_critic_params(key, d_in, hidden):
    """Mirrors CriticNetwork.__init__ + weights_init_: xavier-uniform hidden
    Linear weights, zero biases, LayerNorm gamma=1/beta=0, and the final
    out_features==1 Linear zero-initialized, for both heads."""
    keys = jax.random.split(key, 4)
    zeros = jnp.zeros((hidden,), jnp.float32)
    ones = jnp.ones((hidden,), jnp.float32)
    vec = jnp.stack([jnp.stack([zeros, ones, zeros])] * N_HEADS)  # (2,3,H)
    return {
        "w1": jnp.stack([_xavier_uniform(keys[0], d_in, hidden),
                         _xavier_uniform(keys[1], d_in, hidden)]),
        "v1": vec,                                   # [b1, gamma1, beta1]
        "w2": jnp.stack([_xavier_uniform(keys[2], hidden, hidden),
                         _xavier_uniform(keys[3], hidden, hidden)]),
        "v2": vec,                                   # [b2, gamma2, beta2]
        "w3": jnp.zeros((N_HEADS, 1, hidden), jnp.float32),  # out_features==1 -> zeros
        "b3": jnp.zeros((1, N_HEADS), jnp.float32),
    }


# ------------------------------ pure-JAX ref ---------------------------------
def _layernorm_ref(x, gamma, beta):
    mu = jnp.mean(x, axis=-1, keepdims=True)
    var = jnp.mean(jnp.square(x - mu), axis=-1, keepdims=True)
    return (x - mu) * jax.lax.rsqrt(var + LN_EPS) * gamma + beta


def critic_forward_ref(state, action, params):
    xu = jnp.concatenate([state, action], axis=1)
    outs = []
    for h in range(N_HEADS):
        b1, g1, bt1 = params["v1"][h]
        b2, g2, bt2 = params["v2"][h]
        x = xu @ params["w1"][h] + b1
        x = jax.nn.relu(_layernorm_ref(x, g1, bt1))
        x = x @ params["w2"][h] + b2
        x = jax.nn.relu(_layernorm_ref(x, g2, bt2))
        q = x @ params["w3"][h].T + params["b3"][0, h]
        outs.append(q)
    return outs[0], outs[1]


if __name__ == "__main__":
    # Small SAC-style shapes: input_dim=(12,), n_actions=4, hidden=128, batch=8
    B, STATE_DIM, N_ACTIONS, HIDDEN = 8, 12, 4, 128
    D_IN = STATE_DIM + N_ACTIONS

    key = jax.random.PRNGKey(0)
    k_state, k_action, k_params, k_w3, k_b3 = jax.random.split(key, 5)
    state = jax.random.normal(k_state, (B, STATE_DIM), jnp.float32)
    action = jax.random.normal(k_action, (B, N_ACTIONS), jnp.float32)

    # Spec-faithful params (final Linear zero-initialized, as in weights_init_).
    params = init_critic_params(k_params, D_IN, HIDDEN)

    # Copy with a random final layer so the numerical check is non-trivial.
    params_rand = dict(params)
    params_rand["w3"] = 0.1 * jax.random.normal(k_w3, (N_HEADS, 1, HIDDEN), jnp.float32)
    params_rand["b3"] = 0.1 * jax.random.normal(k_b3, (1, N_HEADS), jnp.float32)

    for p in (params, params_rand):
        q1, q2 = critic_forward(state, action, p)
        q1 = jax.block_until_ready(q1)
        q2 = jax.block_until_ready(q2)
        r1, r2 = critic_forward_ref(state, action, p)
        np.testing.assert_allclose(np.asarray(q1), np.asarray(r1), atol=1e-4, rtol=1e-4)
        np.testing.assert_allclose(np.asarray(q2), np.asarray(r2), atol=1e-4, rtol=1e-4)
        assert q1.shape == (B, 1) and q2.shape == (B, 1)

    print("KERNEL_OK")
</pallas_src>

<mosaic_0001>
module attributes {stable_mosaic.version = 11 : i64} {
  func.func @critic_kernel(%arg0: memref<8x16xf32, #tpu.memory_space<vmem>>, %arg1: memref<2x16x128xf32, #tpu.memory_space<vmem>>, %arg2: memref<2x3x128xf32, #tpu.memory_space<vmem>>, %arg3: memref<2x128x128xf32, #tpu.memory_space<vmem>>, %arg4: memref<2x3x128xf32, #tpu.memory_space<vmem>>, %arg5: memref<2x1x128xf32, #tpu.memory_space<vmem>>, %arg6: memref<1x2xf32, #tpu.memory_space<vmem>>, %arg7: memref<8x2xf32, #tpu.memory_space<vmem>>) attributes {dimension_semantics = [], scalar_prefetch = 0 : i64, scratch_operands = 0 : i64, tpu.core_type = #tpu.core_type<tc>} {
    %c0 = arith.constant 0 : index
    %c0_0 = arith.constant 0 : index
    %0 = vector.load %arg0[%c0, %c0_0] : memref<8x16xf32, #tpu.memory_space<vmem>>, vector<8x16xf32>
    %c0_1 = arith.constant 0 : index
    %c0_2 = arith.constant 0 : index
    %1 = vector.load %arg6[%c0_1, %c0_2] : memref<1x2xf32, #tpu.memory_space<vmem>>, vector<1x2xf32>
    %c0_3 = arith.constant 0 : index
    %c0_4 = arith.constant 0 : index
    %c0_5 = arith.constant 0 : index
    %2 = vector.load %arg2[%c0_3, %c0_4, %c0_5] : memref<2x3x128xf32, #tpu.memory_space<vmem>>, vector<1x3x128xf32>
    %3 = vector.shape_cast %2 : vector<1x3x128xf32> to vector<3x128xf32>
    %c0_6 = arith.constant 0 : index
    %c0_7 = arith.constant 0 : index
    %c0_8 = arith.constant 0 : index
    %4 = vector.load %arg4[%c0_6, %c0_7, %c0_8] : memref<2x3x128xf32, #tpu.memory_space<vmem>>, vector<1x3x128xf32>
    %5 = vector.shape_cast %4 : vector<1x3x128xf32> to vector<3x128xf32>
    %c0_9 = arith.constant 0 : index
    %c0_10 = arith.constant 0 : index
    %c0_11 = arith.constant 0 : index
    %6 = vector.load %arg1[%c0_9, %c0_10, %c0_11] : memref<2x16x128xf32, #tpu.memory_space<vmem>>, vector<1x16x128xf32>
    %7 = vector.shape_cast %6 : vector<1x16x128xf32> to vector<16x128xf32>
    %cst = arith.constant dense<0.000000e+00> : vector<8x128xf32>
    %8 = tpu.matmul %0, %7, %cst {dimension_numbers = #tpu.dot_dimension_numbers<[1], [0], [0], [1], [0, 0, 1, 1], [], []>} : vector<8x16xf32>, vector<16x128xf32>, vector<8x128xf32> -> vector<8x128xf32>
    %9 = vector.extract_strided_slice %3 {offsets = [0, 0], sizes = [1, 128], strides = [1, 1]} : vector<3x128xf32> to vector<1x128xf32>
    %10 = vector.broadcast %9 : vector<1x128xf32> to vector<8x128xf32>
    %11 = arith.addf %8, %10 : vector<8x128xf32>
    %12 = vector.extract_strided_slice %3 {offsets = [1, 0], sizes = [1, 128], strides = [1, 1]} : vector<3x128xf32> to vector<1x128xf32>
    %13 = vector.extract_strided_slice %3 {offsets = [2, 0], sizes = [1, 128], strides = [1, 1]} : vector<3x128xf32> to vector<1x128xf32>
    %cst_12 = arith.constant dense<0.000000e+00> : vector<8xf32>
    %14 = vector.multi_reduction <add>, %11, %cst_12 [1] : vector<8x128xf32> to vector<8xf32>
    %15 = vector.shape_cast %14 : vector<8xf32> to vector<8x1xf32>
    %cst_13 = arith.constant 1.280000e+02 : f32
    %16 = vector.broadcast %cst_13 : f32 to vector<8x1xf32>
    %17 = arith.divf %15, %16 : vector<8x1xf32>
    %18 = arith.mulf %11, %11 : vector<8x128xf32>
    %cst_14 = arith.constant dense<0.000000e+00> : vector<8xf32>
    %19 = vector.multi_reduction <add>, %18, %cst_14 [1] : vector<8x128xf32> to vector<8xf32>
    %20 = vector.shape_cast %19 : vector<8xf32> to vector<8x1xf32>
    %cst_15 = arith.constant 1.280000e+02 : f32
    %21 = vector.broadcast %cst_15 : f32 to vector<8x1xf32>
    %22 = arith.divf %20, %21 : vector<8x1xf32>
    %23 = arith.mulf %17, %17 : vector<8x1xf32>
    %24 = arith.subf %22, %23 : vector<8x1xf32>
    %25 = vector.broadcast %17 : vector<8x1xf32> to vector<8x128xf32>
    %26 = arith.subf %11, %25 : vector<8x128xf32>
    %cst_16 = arith.constant 9.99999974E-6 : f32
    %27 = vector.broadcast %cst_16 : f32 to vector<8x1xf32>
    %28 = arith.addf %24, %27 : vector<8x1xf32>
    %29 = math.rsqrt %28 : vector<8x1xf32>
    %30 = vector.broadcast %29 : vector<8x1xf32> to vector<8x128xf32>
    %31 = arith.mulf %26, %30 : vector<8x128xf32>
    %32 = vector.broadcast %12 : vector<1x128xf32> to vector<8x128xf32>
    %33 = arith.mulf %31, %32 : vector<8x128xf32>
    %34 = vector.broadcast %13 : vector<1x128xf32> to vector<8x128xf32>
    %35 = arith.addf %33, %34 : vector<8x128xf32>
    %cst_17 = arith.constant 0.000000e+00 : f32
    %36 = vector.broadcast %cst_17 : f32 to vector<8x128xf32>
    %37 = arith.maximumf %35, %36 : vector<8x128xf32>
    %c0_18 = arith.constant 0 : index
    %c0_19 = arith.constant 0 : index
    %c0_20 = arith.constant 0 : index
    %38 = vector.load %arg3[%c0_18, %c0_19, %c0_20] : memref<2x128x128xf32, #tpu.memory_space<vmem>>, vector<1x128x128xf32>
    %39 = vector.shape_cast %38 : vector<1x128x128xf32> to vector<128x128xf32>
    %cst_21 = arith.constant dense<0.000000e+00> : vector<8x128xf32>
    %40 = tpu.matmul %37, %39, %cst_21 {dimension_numbers = #tpu.dot_dimension_numbers<[1], [0], [0], [1], [0, 0, 1, 1], [], []>} : vector<8x128xf32>, vector<128x128xf32>, vector<8x128xf32> -> vector<8x128xf32>
    %41 = vector.extract_strided_slice %5 {offsets = [0, 0], sizes = [1, 128], strides = [1, 1]} : vector<3x128xf32> to vector<1x128xf32>
    %42 = vector.broadcast %41 : vector<1x128xf32> to vector<8x128xf32>
    %43 = arith.addf %40, %42 : vector<8x128xf32>
    %44 = vector.extract_strided_slice %5 {offsets = [1, 0], sizes = [1, 128], strides = [1, 1]} : vector<3x128xf32> to vector<1x128xf32>
    %45 = vector.extract_strided_slice %5 {offsets = [2, 0], sizes = [1, 128], strides = [1, 1]} : vector<3x128xf32> to vector<1x128xf32>
    %cst_22 = arith.constant dense<0.000000e+00> : vector<8xf32>
    %46 = vector.multi_reduction <add>, %43, %cst_22 [1] : vector<8x128xf32> to vector<8xf32>
    %47 = vector.shape_cast %46 : vector<8xf32> to vector<8x1xf32>
    %cst_23 = arith.constant 1.280000e+02 : f32
    %48 = vector.broadcast %cst_23 : f32 to vector<8x1xf32>
    %49 = arith.divf %47, %48 : vector<8x1xf32>
    %50 = arith.mulf %43, %43 : vector<8x128xf32>
    %cst_24 = arith.constant dense<0.000000e+00> : vector<8xf32>
    %51 = vector.multi_reduction <add>, %50, %cst_24 [1] : vector<8x128xf32> to vector<8xf32>
    %52 = vector.shape_cast %51 : vector<8xf32> to vector<8x1xf32>
    %cst_25 = arith.constant 1.280000e+02 : f32
    %53 = vector.broadcast %cst_25 : f32 to vector<8x1xf32>
    %54 = arith.divf %52, %53 : vector<8x1xf32>
    %55 = arith.mulf %49, %49 : vector<8x1xf32>
    %56 = arith.subf %54, %55 : vector<8x1xf32>
    %57 = vector.broadcast %49 : vector<8x1xf32> to vector<8x128xf32>
    %58 = arith.subf %43, %57 : vector<8x128xf32>
    %cst_26 = arith.constant 9.99999974E-6 : f32
    %59 = vector.broadcast %cst_26 : f32 to vector<8x1xf32>
    %60 = arith.addf %56, %59 : vector<8x1xf32>
    %61 = math.rsqrt %60 : vector<8x1xf32>
    %62 = vector.broadcast %61 : vector<8x1xf32> to vector<8x128xf32>
    %63 = arith.mulf %58, %62 : vector<8x128xf32>
    %64 = vector.broadcast %44 : vector<1x128xf32> to vector<8x128xf32>
    %65 = arith.mulf %63, %64 : vector<8x128xf32>
    %66 = vector.broadcast %45 : vector<1x128xf32> to vector<8x128xf32>
    %67 = arith.addf %65, %66 : vector<8x128xf32>
    %cst_27 = arith.constant 0.000000e+00 : f32
    %68 = vector.broadcast %cst_27 : f32 to vector<8x128xf32>
    %69 = arith.maximumf %67, %68 : vector<8x128xf32>
    %c0_28 = arith.constant 0 : index
    %c0_29 = arith.constant 0 : index
    %c0_30 = arith.constant 0 : index
    %70 = vector.load %arg5[%c0_28, %c0_29, %c0_30] : memref<2x1x128xf32, #tpu.memory_space<vmem>>, vector<1x1x128xf32>
    %71 = vector.shape_cast %70 : vector<1x1x128xf32> to vector<1x128xf32>
    %72 = vector.broadcast %71 : vector<1x128xf32> to vector<8x128xf32>
    %73 = arith.mulf %69, %72 : vector<8x128xf32>
    %cst_31 = arith.constant dense<0.000000e+00> : vector<8xf32>
    %74 = vector.multi_reduction <add>, %73, %cst_31 [1] : vector<8x128xf32> to vector<8xf32>
    %75 = vector.shape_cast %74 : vector<8xf32> to vector<8x1xf32>
    %76 = vector.extract_strided_slice %1 {offsets = [0, 0], sizes = [1, 1], strides = [1, 1]} : vector<1x2xf32> to vector<1x1xf32>
    %77 = vector.broadcast %76 : vector<1x1xf32> to vector<8x1xf32>
    %78 = arith.addf %75, %77 : vector<8x1xf32>
    %c0_32 = arith.constant 0 : index
    %c0_33 = arith.constant 0 : index
    %79 = vector.load %arg7[%c0_32, %c0_33] : memref<8x2xf32, #tpu.memory_space<vmem>>, vector<8x1xf32>
    tpu.vector_store %arg7[%c0_32, %c0_33], %78 {strides = array<i32>} : memref<8x2xf32, #tpu.memory_space<vmem>>, vector<8x1xf32>,
    %c1 = arith.constant 1 : index
    %c0_34 = arith.constant 0 : index
    %c0_35 = arith.constant 0 : index
    %80 = vector.load %arg2[%c1, %c0_34, %c0_35] : memref<2x3x128xf32, #tpu.memory_space<vmem>>, vector<1x3x128xf32>
    %81 = vector.shape_cast %80 : vector<1x3x128xf32> to vector<3x128xf32>
    %c1_36 = arith.constant 1 : index
    %c0_37 = arith.constant 0 : index
    %c0_38 = arith.constant 0 : index
    %82 = vector.load %arg4[%c1_36, %c0_37, %c0_38] : memref<2x3x128xf32, #tpu.memory_space<vmem>>, vector<1x3x128xf32>
    %83 = vector.shape_cast %82 : vector<1x3x128xf32> to vector<3x128xf32>
    %c1_39 = arith.constant 1 : index
    %c0_40 = arith.constant 0 : index
    %c0_41 = arith.constant 0 : index
    %84 = vector.load %arg1[%c1_39, %c0_40, %c0_41] : memref<2x16x128xf32, #tpu.memory_space<vmem>>, vector<1x16x128xf32>
    %85 = vector.shape_cast %84 : vector<1x16x128xf32> to vector<16x128xf32>
    %cst_42 = arith.constant dense<0.000000e+00> : vector<8x128xf32>
    %86 = tpu.matmul %0, %85, %cst_42 {dimension_numbers = #tpu.dot_dimension_numbers<[1], [0], [0], [1], [0, 0, 1, 1], [], []>} : vector<8x16xf32>, vector<16x128xf32>, vector<8x128xf32> -> vector<8x128xf32>
    %87 = vector.extract_strided_slice %81 {offsets = [0, 0], sizes = [1, 128], strides = [1, 1]} : vector<3x128xf32> to vector<1x128xf32>
    %88 = vector.broadcast %87 : vector<1x128xf32> to vector<8x128xf32>
    %89 = arith.addf %86, %88 : vector<8x128xf32>
    %90 = vector.extract_strided_slice %81 {offsets = [1, 0], sizes = [1, 128], strides = [1, 1]} : vector<3x128xf32> to vector<1x128xf32>
    %91 = vector.extract_strided_slice %81 {offsets = [2, 0], sizes = [1, 128], strides = [1, 1]} : vector<3x128xf32> to vector<1x128xf32>
    %cst_43 = arith.constant dense<0.000000e+00> : vector<8xf32>
    %92 = vector.multi_reduction <add>, %89, %cst_43 [1] : vector<8x128xf32> to vector<8xf32>
    %93 = vector.shape_cast %92 : vector<8xf32> to vector<8x1xf32>
    %cst_44 = arith.constant 1.280000e+02 : f32
    %94 = vector.broadcast %cst_44 : f32 to vector<8x1xf32>
    %95 = arith.divf %93, %94 : vector<8x1xf32>
    %96 = arith.mulf %89, %89 : vector<8x128xf32>
    %cst_45 = arith.constant dense<0.000000e+00> : vector<8xf32>
    %97 = vector.multi_reduction <add>, %96, %cst_45 [1] : vector<8x128xf32> to vector<8xf32>
    %98 = vector.shape_cast %97 : vector<8xf32> to vector<8x1xf32>
    %cst_46 = arith.constant 1.280000e+02 : f32
    %99 = vector.broadcast %cst_46 : f32 to vector<8x1xf32>
    %100 = arith.divf %98, %99 : vector<8x1xf32>
    %101 = arith.mulf %95, %95 : vector<8x1xf32>
    %102 = arith.subf %100, %101 : vector<8x1xf32>
    %103 = vector.broadcast %95 : vector<8x1xf32> to vector<8x128xf32>
    %104 = arith.subf %89, %103 : vector<8x128xf32>
    %cst_47 = arith.constant 9.99999974E-6 : f32
    %105 = vector.broadcast %cst_47 : f32 to vector<8x1xf32>
    %106 = arith.addf %102, %105 : vector<8x1xf32>
    %107 = math.rsqrt %106 : vector<8x1xf32>
    %108 = vector.broadcast %107 : vector<8x1xf32> to vector<8x128xf32>
    %109 = arith.mulf %104, %108 : vector<8x128xf32>
    %110 = vector.broadcast %90 : vector<1x128xf32> to vector<8x128xf32>
    %111 = arith.mulf %109, %110 : vector<8x128xf32>
    %112 = vector.broadcast %91 : vector<1x128xf32> to vector<8x128xf32>
    %113 = arith.addf %111, %112 : vector<8x128xf32>
    %cst_48 = arith.constant 0.000000e+00 : f32
    %114 = vector.broadcast %cst_48 : f32 to vector<8x128xf32>
    %115 = arith.maximumf %113, %114 : vector<8x128xf32>
    %c1_49 = arith.constant 1 : index
    %c0_50 = arith.constant 0 : index
    %c0_51 = arith.constant 0 : index
    %116 = vector.load %arg3[%c1_49, %c0_50, %c0_51] : memref<2x128x128xf32, #tpu.memory_space<vmem>>, vector<1x128x128xf32>
    %117 = vector.shape_cast %116 : vector<1x128x128xf32> to vector<128x128xf32>
    %cst_52 = arith.constant dense<0.000000e+00> : vector<8x128xf32>
    %118 = tpu.matmul %115, %117, %cst_52 {dimension_numbers = #tpu.dot_dimension_numbers<[1], [0], [0], [1], [0, 0, 1, 1], [], []>} : vector<8x128xf32>, vector<128x128xf32>, vector<8x128xf32> -> vector<8x128xf32>
    %119 = vector.extract_strided_slice %83 {offsets = [0, 0], sizes = [1, 128], strides = [1, 1]} : vector<3x128xf32> to vector<1x128xf32>
    %120 = vector.broadcast %119 : vector<1x128xf32> to vector<8x128xf32>
    %121 = arith.addf %118, %120 : vector<8x128xf32>
    %122 = vector.extract_strided_slice %83 {offsets = [1, 0], sizes = [1, 128], strides = [1, 1]} : vector<3x128xf32> to vector<1x128xf32>
    %123 = vector.extract_strided_slice %83 {offsets = [2, 0], sizes = [1, 128], strides = [1, 1]} : vector<3x128xf32> to vector<1x128xf32>
    %cst_53 = arith.constant dense<0.000000e+00> : vector<8xf32>
    %124 = vector.multi_reduction <add>, %121, %cst_53 [1] : vector<8x128xf32> to vector<8xf32>
    %125 = vector.shape_cast %124 : vector<8xf32> to vector<8x1xf32>
    %cst_54 = arith.constant 1.280000e+02 : f32
    %126 = vector.broadcast %cst_54 : f32 to vector<8x1xf32>
    %127 = arith.divf %125, %126 : vector<8x1xf32>
    %128 = arith.mulf %121, %121 : vector<8x128xf32>
    %cst_55 = arith.constant dense<0.000000e+00> : vector<8xf32>
    %129 = vector.multi_reduction <add>, %128, %cst_55 [1] : vector<8x128xf32> to vector<8xf32>
    %130 = vector.shape_cast %129 : vector<8xf32> to vector<8x1xf32>
    %cst_56 = arith.constant 1.280000e+02 : f32
    %131 = vector.broadcast %cst_56 : f32 to vector<8x1xf32>
    %132 = arith.divf %130, %131 : vector<8x1xf32>
    %133 = arith.mulf %127, %127 : vector<8x1xf32>
    %134 = arith.subf %132, %133 : vector<8x1xf32>
    %135 = vector.broadcast %127 : vector<8x1xf32> to vector<8x128xf32>
    %136 = arith.subf %121, %135 : vector<8x128xf32>
    %cst_57 = arith.constant 9.99999974E-6 : f32
    %137 = vector.broadcast %cst_57 : f32 to vector<8x1xf32>
    %138 = arith.addf %134, %137 : vector<8x1xf32>
    %139 = math.rsqrt %138 : vector<8x1xf32>
    %140 = vector.broadcast %139 : vector<8x1xf32> to vector<8x128xf32>
    %141 = arith.mulf %136, %140 : vector<8x128xf32>
    %142 = vector.broadcast %122 : vector<1x128xf32> to vector<8x128xf32>
    %143 = arith.mulf %141, %142 : vector<8x128xf32>
    %144 = vector.broadcast %123 : vector<1x128xf32> to vector<8x128xf32>
    %145 = arith.addf %143, %144 : vector<8x128xf32>
    %cst_58 = arith.constant 0.000000e+00 : f32
    %146 = vector.broadcast %cst_58 : f32 to vector<8x128xf32>
    %147 = arith.maximumf %145, %146 : vector<8x128xf32>
    %c1_59 = arith.constant 1 : index
    %c0_60 = arith.constant 0 : index
    %c0_61 = arith.constant 0 : index
    %148 = vector.load %arg5[%c1_59, %c0_60, %c0_61] : memref<2x1x128xf32, #tpu.memory_space<vmem>>, vector<1x1x128xf32>
    %149 = vector.shape_cast %148 : vector<1x1x128xf32> to vector<1x128xf32>
    %150 = vector.broadcast %149 : vector<1x128xf32> to vector<8x128xf32>
    %151 = arith.mulf %147, %150 : vector<8x128xf32>
    %cst_62 = arith.constant dense<0.000000e+00> : vector<8xf32>
    %152 = vector.multi_reduction <add>, %151, %cst_62 [1] : vector<8x128xf32> to vector<8xf32>
    %153 = vector.shape_cast %152 : vector<8xf32> to vector<8x1xf32>
    %154 = vector.extract_strided_slice %1 {offsets = [0, 1], sizes = [1, 1], strides = [1, 1]} : vector<1x2xf32> to vector<1x1xf32>
    %155 = vector.broadcast %154 : vector<1x1xf32> to vector<8x1xf32>
    %156 = arith.addf %153, %155 : vector<8x1xf32>
    %c0_63 = arith.constant 0 : index
    %c1_64 = arith.constant 1 : index
    %157 = vector.load %arg7[%c0_63, %c1_64] : memref<8x2xf32, #tpu.memory_space<vmem>>, vector<8x1xf32>
    tpu.vector_store %arg7[%c0_63, %c1_64], %156 {strides = array<i32>} : memref<8x2xf32, #tpu.memory_space<vmem>>, vector<8x1xf32>,
    return
  }
}

</mosaic_0001>

<bundles_post_ra>
// kernel: tpu_custom_call.1
= control target key start
LH: loop header
LB: loop body
LE: loop exit
PB: predicated region body
PF: predicated region fallthrough
CT: control target
= control target key end

     0   :  { %12 = vsyncpa [#allocation3], 0  ;;  %s897_s0 = inlined_call_operand.vmem [shape: f32[8,16], index: 0, kind: input, shape index: {}]   ;;  %s898_s1 = inlined_call_operand.hbm [shape: f32[2,16,128], index: 1, kind: input, shape index: {}]   ;;  %s899_s2 = inlined_call_operand.vmem [shape: f32[2,3,128], index: 2, kind: input, shape index: {}]   ;;  %s900_s3 = inlined_call_operand.hbm [shape: f32[2,128,128], index: 3, kind: input, shape index: {}]   ;;  %s901_s4 = inlined_call_operand.vmem [shape: f32[2,3,128], index: 4, kind: input, shape index: {}]   ;;  %s902_s5 = inlined_call_operand.vmem [shape: f32[2,1,128], index: 5, kind: input, shape index: {}]   ;;  %s903_s6 = inlined_call_operand.vmem [shape: f32[1,2], index: 6, kind: input, shape index: {}]   ;;  %s904_s7 = inlined_call_operand.vmem [shape: f32[8,2], index: 7, kind: output, shape index: {}]  }
   0x1   :  { %13 = vsyncpa [#allocation5], 0  ;;  %s726_s24 = smov [#allocation2]  }
   0x2   :  { %s21_s25 = sshll.u32 %s726_s24, 4  ;;  %s22_s25 = int_to_ptr.vmem [resolvable:$true] %s21_s25 }
   0x3   :  { %s690_s26 = scalar_lea.vmem %s22_s25, 512  ;;  %p695_p1 = scmp.lt.s32.totalorder %s22_s25, %s22_s25 }
   0x4   :  { %p691_p0 = scmp.ne.s32.totalorder %s22_s25, %s690_s26  ;;  %p696_p2 = scmp.lt.s32.totalorder %s690_s26, %s690_s26 }
   0x6   :  { %p697_p3 = por %p696_p2, %p695_p1 }
   0x8   :  { %p698_p4 = pnand %p697_p3, %p691_p0 }
   0xa   :  { %701 = shalt.err (!%p698_p4)
}
   0xb   :  { %s727_s27 = smov 128   ;;  %s728_s28 = smov 8  }
   0xc   :  { %27 = dma.hbm_to_vmem [thread:$0]  %s898_s1, 512, %s22_s25, [#allocation3], %s727_s27, %s727_s27, %s728_s28  }
   0xd   :  { %s729_s8 = smov [#allocation4]  }
   0xe   :  { %s35_s9 = sshll.u32 %s729_s8, 4  ;;  %s36_s9 = int_to_ptr.vmem [resolvable:$true] %s35_s9 }
   0xf   :  { %s710_s10 = scalar_lea.vmem %s36_s9, 4096  ;;  %p715_p6 = scmp.lt.s32.totalorder %s36_s9, %s36_s9 }
  0x10   :  { %p711_p5 = scmp.ne.s32.totalorder %s36_s9, %s710_s10  ;;  %p716_p7 = scmp.lt.s32.totalorder %s710_s10, %s710_s10 }
  0x12   :  { %p717_p8 = por %p716_p7, %p715_p6 }
  0x14   :  { %p718_p9 = pnand %p717_p8, %p711_p5 }
  0x16   :  { %721 = shalt.err (!%p718_p9)
}
  0x17   :  { %41 = dma.hbm_to_vmem [thread:$0]  %s900_s3, 4096, %s36_s9, [#allocation5], %s727_s27, %s727_s27, %s728_s28  }
  0x18   :  { %722 = dma.done.wait [#allocation3], 512  }
  0x19   :  { %723 = vsyncadd [#allocation3], 4294966784 }
  0x1a   :  { %724 = dma.done.wait [#allocation5], 4096  }
  0x1b   :  { %725 = vsyncadd [#allocation5], 4294963200  ;;  %v730_v0 = vmov 0.0   ;;  %vm731_vm0 = vmmov 0   ;;  %v59_v1 = vld [vmem:[#allocation2 + $0x8] sm:$0xff]  ;;  %v58_v2 = vld [vmem:[#allocation2] sm:$0xff]  ;;  %v60_v7 = vlaneseq }
  0x1c   :  { %584 = vmatprep.subr.mxu1 %v730_v0  ;;  %626 = vmatprep.subr.mxu0 %v730_v0  ;;  %v302_v3 = vld [vmem:[#allocation2 + $0x18] sm:$0xff]  ;;  %v54_v4 = vld [vmem:[%s897_s0] sm:$0xff]  ;;  %vm64_vm1 = vcmask 130048   ;;  %v301_v5 = vld [vmem:[#allocation2 + $0x10] sm:$0xff]  ;;  %vm294_vm2 = vcmask 7168   ;;  %vm528_vm3 = vcmask 15368  }
  0x1d   :  { %588 = vmatprep.mubr.msk.f32.mxu1 %vm731_vm0, %v730_v0  ;;  %630 = vmatprep.mubr.msk.f32.mxu0 %vm731_vm0, %v730_v0  ;;  %v178_v6 = vld [vmem:[#allocation4 + $0x78] sm:$0xff]  ;;  %v796_v8 = vshrl.u32 %v60_v7, 7  ;;  %v804_v10 = vld [vmem:[%s899_s2] sm:$0x7]  ;;  %v809_v11 = vld [vmem:[%s899_s2 + $0x4] sm:$0x7] }
  0x1e   :  { %585 = vmatpush3.msra.mxu1 %v59_v1  ;;  %627 = vmatpush3.msra.mxu0 %v302_v3  ;;  %v177_v22 = vld [vmem:[#allocation4 + $0x70] sm:$0xff]  ;;  %v176_v23 = vld [vmem:[#allocation4 + $0x68] sm:$0xff]  ;;  %v417_v24 = vld [vmem:[#allocation4 + $0xf8] sm:$0xff] }
  0x1f   :  { %586 = vmatprep.subr.mxu1 %v730_v0  ;;  %628 = vmatprep.subr.mxu0 %v730_v0  ;;  %v799_v9 = vsub.s32 0, %v796_v8  ;;  %v175_v25 = vld [vmem:[#allocation4 + $0x60] sm:$0xff]  ;;  %v416_v26 = vld [vmem:[#allocation4 + $0xf0] sm:$0xff]  ;;  %v174_v27 = vld [vmem:[#allocation4 + $0x58] sm:$0xff] }
  0x20   :  { %587 = vmatpush3.msra.mxu1 %v58_v2  ;;  %629 = vmatpush3.msra.mxu0 %v301_v5  ;;  %v415_v28 = vld [vmem:[#allocation4 + $0xe8] sm:$0xff]  ;;  %v173_v29 = vld [vmem:[#allocation4 + $0x50] sm:$0xff]  ;;  %v414_v30 = vld [vmem:[#allocation4 + $0xe0] sm:$0xff] }
  0x21   :  { %589 = vmatmul.mubr.msk.f32.vlgmr.msra.gmra.mxu1 %vm64_vm1, %v54_v4  ;;  %631 = vmatmul.mubr.msk.f32.vlgmr.msra.gmra.mxu0 %vm64_vm1, %v54_v4  ;;  %v63_v12 = vrot.slane %v804_v10, %v799_v9  ;;  %v306_v13 = vrot.slane %v809_v11, %v799_v9  ;;  %v172_v31 = vld [vmem:[#allocation4 + $0x48] sm:$0xff]  ;;  %v413_v32 = vld [vmem:[#allocation4 + $0xd8] sm:$0xff]  ;;  %v171_v33 = vld [vmem:[#allocation4 + $0x40] sm:$0xff]  ;;  %v855_v4 = vsub.s32 1, %v796_v8 }
  0x22   :  { %591 = vmatprep.subr.mxu1 %v730_v0  ;;  %633 = vmatprep.subr.mxu0 %v730_v0  ;;  %v412_v34 = vld [vmem:[#allocation4 + $0xd0] sm:$0xff]  ;;  %v170_v35 = vld [vmem:[#allocation4 + $0x38] sm:$0xff]  ;;  %v411_v36 = vld [vmem:[#allocation4 + $0xc8] sm:$0xff] }
  0x23   :  { %623 = vmatprep.mubr.msk.f32.mxu1 %vm731_vm0, %v730_v0  ;;  %665 = vmatprep.mubr.msk.f32.mxu0 %vm731_vm0, %v730_v0  ;;  %v169_v37 = vld [vmem:[#allocation4 + $0x30] sm:$0xff]  ;;  %v410_v38 = vld [vmem:[#allocation4 + $0xc0] sm:$0xff]  ;;  %v168_v39 = vld [vmem:[#allocation4 + $0x28] sm:$0xff]  ;;  %v155_v5 = vrot.slane %v804_v10, %v855_v4 }
  0x24   :  { %592 = vmatpush3.msra.mxu1 %v178_v6  ;;  %634 = vmatpush3.msra.mxu0 %v417_v24  ;;  %v409_v40 = vld [vmem:[#allocation4 + $0xb8] sm:$0xff]  ;;  %v167_v41 = vld [vmem:[#allocation4 + $0x20] sm:$0xff]  ;;  %v408_v42 = vld [vmem:[#allocation4 + $0xb0] sm:$0xff] }
  0x25   :  { %593 = vmatprep.subr.mxu1 %v730_v0  ;;  %635 = vmatprep.subr.mxu0 %v730_v0  ;;  %v166_v43 = vld [vmem:[#allocation4 + $0x18] sm:$0xff]  ;;  %v407_v44 = vld [vmem:[#allocation4 + $0xa8] sm:$0xff]  ;;  %v165_v45 = vld [vmem:[#allocation4 + $0x10] sm:$0xff] }
  0x26   :  { %594 = vmatpush3.msra.mxu1 %v177_v22  ;;  %636 = vmatpush3.msra.mxu0 %v416_v26  ;;  %v406_v46 = vld [vmem:[#allocation4 + $0xa0] sm:$0xff]  ;;  %v164_v47 = vld [vmem:[#allocation4 + $0x8] sm:$0xff]  ;;  %v405_v48 = vld [vmem:[#allocation4 + $0x98] sm:$0xff] }
  0x27   :  { %595 = vmatprep.subr.mxu1 %v730_v0  ;;  %637 = vmatprep.subr.mxu0 %v730_v0  ;;  %v163_v49 = vld [vmem:[#allocation4] sm:$0xff]  ;;  %v404_v50 = vld [vmem:[#allocation4 + $0x90] sm:$0xff]  ;;  %v403_v51 = vld [vmem:[#allocation4 + $0x88] sm:$0xff] }
  0x28   :  { %596 = vmatpush3.msra.mxu1 %v176_v23  ;;  %638 = vmatpush3.msra.mxu0 %v415_v28  ;;  %v402_v52 = vld [vmem:[#allocation4 + $0x80] sm:$0xff] }
  0x29   :  { %597 = vmatprep.subr.mxu1 %v730_v0  ;;  %639 = vmatprep.subr.mxu0 %v730_v0 }
  0x2a   :  { %598 = vmatpush3.msra.mxu1 %v175_v25  ;;  %640 = vmatpush3.msra.mxu0 %v414_v30 }
  0x2b   :  { %599 = vmatprep.subr.mxu1 %v730_v0  ;;  %641 = vmatprep.subr.mxu0 %v730_v0 }
  0x2c   :  { %600 = vmatpush3.msra.mxu1 %v174_v27  ;;  %642 = vmatpush3.msra.mxu0 %v413_v32 }
  0x2d   :  { %601 = vmatprep.subr.mxu1 %v730_v0  ;;  %643 = vmatprep.subr.mxu0 %v730_v0 }
  0x2e   :  { %602 = vmatpush3.msra.mxu1 %v173_v29  ;;  %644 = vmatpush3.msra.mxu0 %v412_v34 }
  0x2f   :  { %603 = vmatprep.subr.mxu1 %v730_v0  ;;  %645 = vmatprep.subr.mxu0 %v730_v0 }
  0x30   :  { %604 = vmatpush3.msra.mxu1 %v172_v31  ;;  %646 = vmatpush3.msra.mxu0 %v411_v36 }
  0x31   :  { %605 = vmatprep.subr.mxu1 %v730_v0  ;;  %647 = vmatprep.subr.mxu0 %v730_v0 }
  0x32   :  { %606 = vmatpush3.msra.mxu1 %v171_v33  ;;  %648 = vmatpush3.msra.mxu0 %v410_v38 }
  0x33   :  { %607 = vmatprep.subr.mxu1 %v730_v0  ;;  %649 = vmatprep.subr.mxu0 %v730_v0 }
  0x34   :  { %608 = vmatpush3.msra.mxu1 %v170_v35  ;;  %650 = vmatpush3.msra.mxu0 %v409_v40 }
  0x35   :  { %609 = vmatprep.subr.mxu1 %v730_v0  ;;  %651 = vmatprep.subr.mxu0 %v730_v0 }
  0x36   :  { %610 = vmatpush3.msra.mxu1 %v169_v37  ;;  %652 = vmatpush3.msra.mxu0 %v408_v42 }
  0x37   :  { %611 = vmatprep.subr.mxu1 %v730_v0  ;;  %653 = vmatprep.subr.mxu0 %v730_v0 }
  0x38   :  { %612 = vmatpush3.msra.mxu1 %v168_v39  ;;  %654 = vmatpush3.msra.mxu0 %v407_v44 }
  0x39   :  { %613 = vmatprep.subr.mxu1 %v730_v0  ;;  %655 = vmatprep.subr.mxu0 %v730_v0 }
  0x3a   :  { %614 = vmatpush3.msra.mxu1 %v167_v41  ;;  %656 = vmatpush3.msra.mxu0 %v406_v46 }
  0x3b   :  { %615 = vmatprep.subr.mxu1 %v730_v0  ;;  %657 = vmatprep.subr.mxu0 %v730_v0 }
  0x3c   :  { %616 = vmatpush3.msra.mxu1 %v166_v43  ;;  %658 = vmatpush3.msra.mxu0 %v405_v48 }
  0x3d   :  { %617 = vmatprep.subr.mxu1 %v730_v0  ;;  %659 = vmatprep.subr.mxu0 %v730_v0 }
  0x3e   :  { %618 = vmatpush3.msra.mxu1 %v165_v45  ;;  %660 = vmatpush3.msra.mxu0 %v404_v50 }
  0x3f   :  { %619 = vmatprep.subr.mxu1 %v730_v0  ;;  %661 = vmatprep.subr.mxu0 %v730_v0 }
  0x40   :  { %620 = vmatpush3.msra.mxu1 %v164_v47  ;;  %662 = vmatpush3.msra.mxu0 %v403_v51 }
  0x41   :  { %621 = vmatprep.subr.mxu1 %v730_v0  ;;  %663 = vmatprep.subr.mxu0 %v730_v0  ;;  %v858_v0 = vsub.s32 2, %v796_v8 }
  0x42   :  { %622 = vmatpush3.msra.mxu1 %v163_v49  ;;  %664 = vmatpush3.msra.mxu0 %v402_v52 }
  0x43   :  { %v398_v8 = vrot.slane %v809_v11, %v858_v0 }
  0xe1   :  { %v134_v14 = vpop.f32.mrf.mxu1  ;;  %v373_v15 = vpop.f32.mrf.mxu0 }
  0xe2   :  { %v815_v16 = vadd.f32 %v134_v14, %v63_v12  ;;  %v817_v17 = vadd.f32 %v373_v15, %v306_v13  ;;  %v160_v12 = vrot.slane %v804_v10, %v858_v0  ;;  %v393_v14 = vrot.slane %v809_v11, %v855_v4  ;;  %v57_v10 = vld [vmem:[%s901_s4] sm:$0x7] }
  0xe3   :  { %v590_v18 = vpop.f32.mrf.mxu1  ;;  %v632_v19 = vpop.f32.mrf.mxu0  ;;  %v182_v25 = vrot.slane %v57_v10, %v799_v9  ;;  %v269_v47 = vrot.slane %v57_v10, %v855_v4  ;;  %v274_v51 = vrot.slane %v57_v10, %v858_v0 }
  0xe4   :  { %138 = vadd.xlane.f32.xlu0 %v815_v16  ;;  %v142_v20 = vmul.f32 %v815_v16, %v815_v16  ;;  %v380_v21 = vmul.f32 %v817_v17, %v817_v17 }
  0xe6   :  { %143 = vadd.xlane.f32.xlu1 %v142_v20 }
  0xe8   :  { %377 = vadd.xlane.f32.xlu0 %v817_v17 }
  0xea   :  { %381 = vadd.xlane.f32.xlu1 %v380_v21 }
 0x16d   :  { %v139_v53 = vpop.xlane.xlu0 %138 }
 0x16e   :  { %v141_v54 = vmul.f32 0.0078125, %v139_v53 }
 0x16f   :  { %v144_v55 = vpop.xlane.xlu1 %143 }
 0x170   :  { %v146_v56 = vmul.f32 %v141_v54, %v141_v54  ;;  %v145_v57 = vmul.f32 0.0078125, %v144_v55  ;;  %v148_v6 = vsub.f32 %v815_v16, %v141_v54 }
 0x171   :  { %v378_v58 = vpop.xlane.xlu0 %377 }
 0x172   :  { %v147_v59 = vsub.f32 %v145_v57, %v146_v56  ;;  %v379_v60 = vmul.f32 0.0078125, %v378_v58 }
 0x173   :  { %v382_v61 = vpop.xlane.xlu1 %381 }
 0x174   :  { %v149_v62 = vadd.f32 1e-05, %v147_v59  ;;  %v384_v63 = vmul.f32 %v379_v60, %v379_v60  ;;  %v383_v1 = vmul.f32 0.0078125, %v382_v61  ;;  %v386_v15 = vsub.f32 %v817_v17, %v379_v60  ;;  %v540_v17 = vld [vmem:[%s901_s4 + $0x4] sm:$0x7] }
 0x175   :  { %v421_v27 = vrot.slane %v540_v17, %v799_v9  ;;  %v508_v52 = vrot.slane %v540_v17, %v855_v4  ;;  %v513_v58 = vrot.slane %v540_v17, %v858_v0  ;;  %v537_v59 = vld [vmem:[%s902_s5] ss:$0 sm:$0xff] }
 0x176   :  { %674 = vrsqrt.f32 %v149_v62  ;;  %v385_v2 = vsub.f32 %v383_v1, %v384_v63  ;;  %v543_v1 = vld [vmem:[%s902_s5 + $0x1] ss:$0 sm:$0xff]  ;;  %v538_v4 = vld [vmem:[%s903_s6] ss:$0 sm:$0xff] }
 0x178   :  { %v387_v3 = vadd.f32 1e-05, %v385_v2 }
 0x17a   :  { %676 = vrsqrt.f32 %v387_v3 }
 0x183   :  { %v675_v7 = vpop.eup %674 }
 0x184   :  { %v151_v13 = vmul.f32 %v675_v7, %v148_v6 }
 0x186   :  { %v156_v18 = vmul.f32 %v155_v5, %v151_v13 }
 0x187   :  { %v677_v19 = vpop.eup %676 }
 0x188   :  { %v161_v20 = vadd.f32 %v160_v12, %v156_v18  ;;  %v389_v21 = vmul.f32 %v677_v19, %v386_v15 }
 0x18a   :  { %v162_v22 = vmax.f32 %v161_v20, 0.0  ;;  %v394_v23 = vmul.f32 %v393_v14, %v389_v21 }
 0x18c   :  { %624 = vmatmul.mubr.f32.vlgmr.msra.gmra.mxu1 %v162_v22  ;;  %v399_v16 = vadd.f32 %v398_v8, %v394_v23 }
 0x18e   :  { %v400_v24 = vmax.f32 %v399_v16, 0.0 }
 0x190   :  { %666 = vmatmul.mubr.f32.vlgmr.msra.gmra.mxu0 %v400_v24 }
 0x24c   :  { %v249_v26 = vpop.f32.mrf.mxu1 }
 0x24d   :  { %v250_v11 = vadd.f32 %v249_v26, %v182_v25 }
 0x24e   :  { %v625_v28 = vpop.f32.mrf.mxu1 }
 0x24f   :  { %253 = vadd.xlane.f32.xlu0 %v250_v11  ;;  %v256_v31 = vmul.f32 %v250_v11, %v250_v11 }
 0x250   :  { %v488_v29 = vpop.f32.mrf.mxu0 }
 0x251   :  { %v489_v30 = vadd.f32 %v488_v29, %v421_v27 }
 0x252   :  { %v667_v32 = vpop.f32.mrf.mxu0 }
 0x253   :  { %492 = vadd.xlane.f32.xlu1 %v489_v30  ;;  %257 = vadd.xlane.f32.xlu0 %v256_v31  ;;  %v495_v33 = vmul.f32 %v489_v30, %v489_v30 }
 0x257   :  { %496 = vadd.xlane.f32.xlu1 %v495_v33 }
 0x2d8   :  { %v254_v34 = vpop.xlane.xlu0 %253 }
 0x2d9   :  { %v255_v35 = vmul.f32 0.0078125, %v254_v34 }
 0x2db   :  { %v260_v38 = vmul.f32 %v255_v35, %v255_v35  ;;  %v262_v48 = vsub.f32 %v250_v11, %v255_v35 }
 0x2dc   :  { %v493_v36 = vpop.xlane.xlu1 %492  ;;  %v258_v37 = vpop.xlane.xlu0 %257 }
 0x2dd   :  { %v494_v39 = vmul.f32 0.0078125, %v493_v36  ;;  %v259_v40 = vmul.f32 0.0078125, %v258_v37 }
 0x2df   :  { %v261_v41 = vsub.f32 %v259_v40, %v260_v38  ;;  %v499_v9 = vmul.f32 %v494_v39, %v494_v39  ;;  %v501_v53 = vsub.f32 %v489_v30, %v494_v39 }
 0x2e0   :  { %v497_v42 = vpop.xlane.xlu1 %496 }
 0x2e1   :  { %v263_v43 = vadd.f32 1e-05, %v261_v41  ;;  %v498_v44 = vmul.f32 0.0078125, %v497_v42 }
 0x2e3   :  { %678 = vrsqrt.f32 %v263_v43  ;;  %v500_v45 = vsub.f32 %v498_v44, %v499_v9 }
 0x2e5   :  { %v502_v46 = vadd.f32 1e-05, %v500_v45 }
 0x2e7   :  { %680 = vrsqrt.f32 %v502_v46 }
 0x2f0   :  { %v679_v49 = vpop.eup %678 }
 0x2f1   :  { %v265_v50 = vmul.f32 %v679_v49, %v262_v48 }
 0x2f3   :  { %v270_v54 = vmul.f32 %v269_v47, %v265_v50 }
 0x2f4   :  { %v681_v55 = vpop.eup %680 }
 0x2f5   :  { %v275_v56 = vadd.f32 %v274_v51, %v270_v54  ;;  %v504_v57 = vmul.f32 %v681_v55, %v501_v53 }
 0x2f7   :  { %v276_v60 = vmax.f32 %v275_v56, 0.0  ;;  %v509_v61 = vmul.f32 %v508_v52, %v504_v57 }
 0x2f9   :  { %v284_v62 = vmul.f32 %v537_v59, %v276_v60  ;;  %v514_v63 = vadd.f32 %v513_v58, %v509_v61 }
 0x2fb   :  { %285 = vadd.xlane.f32.xlu0 %v284_v62  ;;  %v515_v2 = vmax.f32 %v514_v63, 0.0 }
 0x2fd   :  { %v524_v3 = vmul.f32 %v543_v1, %v515_v2 }
 0x2ff   :  { %525 = vadd.xlane.f32.xlu1 %v524_v3 }
 0x384   :  { %v286_v0 = vpop.xlane.xlu0 %285 }
 0x385   :  { %v293_v5 = vadd.f32 %v538_v4, %v286_v0 }
 0x387   :  { %295 = vst.msk [vmem:[%s904_s7] sm:$0xff] %vm294_vm2, %v293_v5 }
 0x388   :  { %v526_v6 = vpop.xlane.xlu1 %525 }
 0x389   :  { %v527_v7 = vadd.f32 %v538_v4, %v526_v6 }
 0x38b   :  { %529 = vst.msk [vmem:[%s904_s7] sm:$0xff] %vm528_vm3, %v527_v7 }
 0x38c   :  { %534 = vsyncpa [#allocation3], 1 }
 0x38d   :  { %535 = vsyncpa [#allocation5], 1 }

</bundles_post_ra>
